<compile_context>
chip_gen: v5e
topology: v5e:2x2
jax: 0.10.0
libtpu: 0.0.40
codegen_flags: <defaults>
</compile_context>

<pallas_src>
import functools

import jax
import jax.numpy as jnp
from jax import lax
from jax.experimental import pallas as pl
from jax.experimental.pallas import tpu as pltpu


def _round_up(x, m):
    return (x + m - 1) // m * m


def _vmem_limit_bytes():
    # ~3/4 of physical VMEM: ~48 MiB on v7x (64 MiB/TC), ~96 MiB on v5e/v6e (128 MiB).
    try:
        cap = int(pltpu.get_tpu_info().vmem_capacity_bytes)
    except Exception:
        cap = 64 * 1024 * 1024
    return min(cap * 3 // 4, 100 * 1024 * 1024)


# --------------------------------------------------------------------------
# Kernel 1: xw = pro_embed @ W          (large row blocks, bf16 MXU, f32 acc)
# --------------------------------------------------------------------------
def _xw_kernel(pro_ref, w_ref, xw_ref):
    xw_ref[...] = jnp.dot(
        pro_ref[...], w_ref[...], preferred_element_type=jnp.float32
    ).astype(xw_ref.dtype)


# --------------------------------------------------------------------------
# Kernel 2: pro_out = pro + adj @ xw + b
#   grid = (rows, k);  k is the reduction axis (last, "arbitrary").
#   adj streamed in (bm, bk) tiles; xw is VMEM-resident (read from HBM once)
#   and sliced per k-step; f32 VMEM accumulator, init at k==0, finalize
#   (residual + bias) at k==last.
# --------------------------------------------------------------------------
def _gcn_kernel(adj_ref, xw_ref, pro_ref, b_ref, out_ref, acc_ref, *, bk):
    k = pl.program_id(1)

    @pl.when(k == 0)
    def _():
        acc_ref[...] = jnp.zeros_like(acc_ref)

    ks = pl.multiple_of(k * bk, bk)
    acc_ref[...] += jnp.dot(
        adj_ref[...], xw_ref[pl.ds(ks, bk), :], preferred_element_type=jnp.float32
    )

    @pl.when(k == pl.num_programs(1) - 1)
    def _():
        out_ref[...] = (pro_ref[...] + acc_ref[...] + b_ref[...]).astype(out_ref.dtype)


# --------------------------------------------------------------------------
# Kernel 3: row gather + answer-embedding lookup.
#   lp/la/np index vectors are scalar-prefetched into SMEM; pro_out stays
#   VMEM-resident (constant block index). 8 rows are gathered per inner
#   iteration and written as one sublane-dense (8, d_pad) store.
# --------------------------------------------------------------------------
def _gather_kernel(lp_ref, la_ref, np_ref, pro_out_ref, ans_ref,
                   x_ref, nxt_ref, *, rows_per_block):
    i = pl.program_id(0)
    base = i * rows_per_block
    n_groups = rows_per_block // 8

    def group_body(g, carry):
        gbase = base + g * 8
        x_rows = []
        n_rows = []
        for r in range(8):                       # static unroll: 8 rows per group
            lp = lp_ref[gbase + r]               # SMEM scalar reads
            la = la_ref[gbase + r]
            nx = np_ref[gbase + r]
            row_lp = pro_out_ref[pl.ds(lp, 1), :]    # (1, d_pad) dynamic row gather
            row_nx = pro_out_ref[pl.ds(nx, 1), :]
            ans_row = ans_ref[pl.ds(la, 1), :]       # nn.Embedding(2, d) lookup
            x_rows.append(row_lp + ans_row)
            n_rows.append(row_nx)
        out_start = pl.multiple_of(g * 8, 8)
        x_ref[pl.ds(out_start, 8), :] = jnp.concatenate(x_rows, axis=0)
        nxt_ref[pl.ds(out_start, 8), :] = jnp.concatenate(n_rows, axis=0)
        return carry

    lax.fori_loop(0, n_groups, group_body, 0)


# --------------------------------------------------------------------------
# Wrapper reproducing ABQR.forward (perb=None path)
# --------------------------------------------------------------------------
def abqr_forward(params, last_pro, last_ans, last_skill, next_pro, next_skill,
                 matrix, perb=None, *,
                 compute_dtype=jnp.bfloat16,     # MXU operand dtype (f32 accumulate)
                 block_m=512, block_k=2048,      # fits all of v5e/v6e/v7x VMEM budgets
                 gather_rows_per_block=256):
    del last_skill, next_skill, perb  # unused in this branch (matches PyTorch)

    pro_embed = params["pro_embed"]
    N, d = pro_embed.shape
    batch, seq = last_pro.shape
    M = batch * seq

    # ---- tile sizes & independent row/col padding ----
    d_pad = _round_up(d, 128)
    bm = min(_round_up(block_m, 8), _round_up(N, 8))        # row tile (multiple of 8)
    bk = min(_round_up(block_k, 128), _round_up(N, 128))    # reduction tile (multiple of 128)
    N_pad_m = _round_up(N, bm)     # adjacency rows / pro_out rows
    N_pad_k = _round_up(N, bk)     # adjacency cols / xw rows

    tb = min(_round_up(gather_rows_per_block, 8), _round_up(M, 8))
    M_pad = _round_up(M, tb)

    def pad2(a, rows, cols):
        return jnp.pad(a, ((0, rows - a.shape[0]), (0, cols - a.shape[1])))

    pro_f32 = pro_embed.astype(jnp.float32)
    pro_k_lo = pad2(pro_f32, N_pad_k, d_pad).astype(compute_dtype)     # kernel-1 input
    pro_m_f32 = pad2(pro_f32, N_pad_m, d_pad)                          # kernel-2 residual
    adj_lo = pad2(matrix.astype(jnp.float32), N_pad_m, N_pad_k).astype(compute_dtype)
    w_lo = pad2(params["gcn_w"].astype(jnp.float32), d_pad, d_pad).astype(compute_dtype)
    b_f32 = pad2(params["gcn_b"].reshape(1, d).astype(jnp.float32), 1, d_pad)
    ans_f32 = pad2(params["ans_embed"].astype(jnp.float32), 2, d_pad)

    vmem_limit = _vmem_limit_bytes()

    # ---- kernel 1: xw = pro @ W  (row block = bk -> DMA-bound, not step-bound) ----
    xw = pl.pallas_call(
        _xw_kernel,
        out_shape=jax.ShapeDtypeStruct((N_pad_k, d_pad), compute_dtype),
        grid=(N_pad_k // bk,),
        in_specs=[pl.BlockSpec((bk, d_pad), lambda i: (i, 0)),
                  pl.BlockSpec((d_pad, d_pad), lambda i: (0, 0))],
        out_specs=pl.BlockSpec((bk, d_pad), lambda i: (i, 0)),
        compiler_params=pltpu.CompilerParams(
            dimension_semantics=("parallel",),
            vmem_limit_bytes=vmem_limit),
    )(pro_k_lo, w_lo)

    # ---- kernel 2: pro_out = pro + adj @ xw + b ----
    itemsize = jnp.dtype(compute_dtype).itemsize
    gcn_cost = pl.CostEstimate(
        flops=2 * N_pad_m * N_pad_k * d_pad,
        transcendentals=0,
        bytes_accessed=(N_pad_m * N_pad_k * itemsize   # adjacency (streamed once)
                        + N_pad_k * d_pad * itemsize   # xw (VMEM-resident, read once)
                        + N_pad_m * d_pad * 4          # pro residual
                        + N_pad_m * d_pad * 4))        # out
    pro_out = pl.pallas_call(
        functools.partial(_gcn_kernel, bk=bk),
        out_shape=jax.ShapeDtypeStruct((N_pad_m, d_pad), jnp.float32),
        grid=(N_pad_m // bm, N_pad_k // bk),
        in_specs=[pl.BlockSpec((bm, bk), lambda i, k: (i, k)),          # adjacency tile
                  pl.BlockSpec((N_pad_k, d_pad), lambda i, k: (0, 0)),  # xw, resident
                  pl.BlockSpec((bm, d_pad), lambda i, k: (i, 0)),       # residual pro tile
                  pl.BlockSpec((1, d_pad), lambda i, k: (0, 0))],       # bias
        out_specs=pl.BlockSpec((bm, d_pad), lambda i, k: (i, 0)),
        scratch_shapes=[pltpu.VMEM((bm, d_pad), jnp.float32)],
        compiler_params=pltpu.CompilerParams(
            dimension_semantics=("parallel", "arbitrary"),
            vmem_limit_bytes=vmem_limit),
        cost_estimate=gcn_cost,
    )(adj_lo, xw, pro_m_f32, b_f32)

    # ---- kernel 3: gather (last_pro, next_pro) rows + ans_embed lookup ----
    def prep_idx(a, hi):
        # clamp defensively: OOB reads on a VMEM ref are unchecked on TPU
        flat = jnp.clip(a.reshape(-1).astype(jnp.int32), 0, hi)
        return jnp.pad(flat, (0, M_pad - M))

    lp = prep_idx(last_pro, N - 1)
    la = prep_idx(last_ans, 1)
    nx = prep_idx(next_pro, N - 1)

    gather = functools.partial(_gather_kernel, rows_per_block=tb)
    X_pad, next_pad = pl.pallas_call(
        gather,
        out_shape=(jax.ShapeDtypeStruct((M_pad, d_pad), jnp.float32),
                   jax.ShapeDtypeStruct((M_pad, d_pad), jnp.float32)),
        grid_spec=pltpu.PrefetchScalarGridSpec(
            num_scalar_prefetch=3,
            grid=(M_pad // tb,),
            in_specs=[pl.BlockSpec((N_pad_m, d_pad), lambda i, lp, la, np_: (0, 0)),
                      pl.BlockSpec((2, d_pad), lambda i, lp, la, np_: (0, 0))],
            out_specs=[pl.BlockSpec((tb, d_pad), lambda i, lp, la, np_: (i, 0)),
                       pl.BlockSpec((tb, d_pad), lambda i, lp, la, np_: (i, 0))],
        ),
        compiler_params=pltpu.CompilerParams(
            dimension_semantics=("parallel",),
            vmem_limit_bytes=vmem_limit),
    )(lp, la, nx, pro_out, ans_f32)

    X = X_pad[:M, :d].reshape(batch, seq, d)
    next_pro_embed = next_pad[:M, :d].reshape(batch, seq, d)
    contrast_loss = 0.1 * jnp.float32(0.0)   # BGRL returns tensor(0.0) when perb is None
    return X, next_pro_embed, contrast_loss


def _xavier_uniform(key, shape):
    fan_in, fan_out = shape[0], shape[1]
    bound = (6.0 / (fan_in + fan_out)) ** 0.5
    return jax.random.uniform(key, shape, jnp.float32, -bound, bound)


if __name__ == "__main__":
    # Small shapes consistent with the module.
    batch, seq, d, pro_max = 2, 8, 32, 64

    key = jax.random.PRNGKey(0)
    k_pro, k_w, k_ans, k_adj, k_lp, k_la, k_np = jax.random.split(key, 7)

    params = {
        "pro_embed": _xavier_uniform(k_pro, (pro_max, d)),   # nn.Parameter + xavier
        "gcn_w": _xavier_uniform(k_w, (d, d)),                # GCNConv.w (xavier)
        "gcn_b": jnp.zeros((d,), jnp.float32),                # GCNConv.b (zeros)
        "ans_embed": _xavier_uniform(k_ans, (2, d)),          # nn.Embedding(2, d), xavier
    }

    matrix = jax.random.uniform(k_adj, (pro_max, pro_max), jnp.float32)
    last_pro = jax.random.randint(k_lp, (batch, seq), 0, pro_max)
    last_ans = jax.random.randint(k_la, (batch, seq), 0, 2)
    next_pro = jax.random.randint(k_np, (batch, seq), 0, pro_max)
    last_skill = jnp.zeros((batch, seq), jnp.int32)   # unused in forward
    next_skill = jnp.zeros((batch, seq), jnp.int32)   # unused in forward

    X, next_pro_embed, contrast_loss = abqr_forward(
        params, last_pro, last_ans, last_skill, next_pro, next_skill, matrix)
    jax.block_until_ready((X, next_pro_embed, contrast_loss))

    # Reference (a): mirrors the kernel's bf16 MXU casts -> tight tolerance.
    xw_ref = jnp.dot(params["pro_embed"].astype(jnp.bfloat16),
                     params["gcn_w"].astype(jnp.bfloat16),
                     preferred_element_type=jnp.float32).astype(jnp.bfloat16)
    h_ref = jnp.dot(matrix.astype(jnp.bfloat16), xw_ref,
                    preferred_element_type=jnp.float32)
    pro_out_b = params["pro_embed"] + h_ref + params["gcn_b"]
    X_b = pro_out_b[last_pro] + params["ans_embed"][last_ans]
    next_b = pro_out_b[next_pro]

    # Reference (b): full-f32 module math -> loose tolerance (bf16 MXU operands).
    pro_out_f = params["pro_embed"] + (
        matrix @ (params["pro_embed"] @ params["gcn_w"]) + params["gcn_b"])
    X_f = pro_out_f[last_pro] + params["ans_embed"][last_ans]
    next_f = pro_out_f[next_pro]

    assert X.shape == (batch, seq, d) and next_pro_embed.shape == (batch, seq, d)
    assert jnp.allclose(X, X_b, rtol=1e-2, atol=1e-2)
    assert jnp.allclose(next_pro_embed, next_b, rtol=1e-2, atol=1e-2)
    assert jnp.allclose(X, X_f, rtol=0.0, atol=5e-2)
    assert jnp.allclose(next_pro_embed, next_f, rtol=0.0, atol=5e-2)
    assert float(contrast_loss) == 0.0

    print("KERNEL_OK")
</pallas_src>

<mosaic_0001>
module attributes {stable_mosaic.version = 11 : i64} {
  func.func @_xw_kernel(%arg0: i32, %arg1: memref<128x128xbf16, #tpu.memory_space<vmem>>, %arg2: memref<128x128xbf16, #tpu.memory_space<vmem>>, %arg3: memref<128x128xbf16, #tpu.memory_space<vmem>>) attributes {dimension_semantics = [#tpu.dimension_semantics<parallel>], iteration_bounds = array<i64: 1>, scalar_prefetch = 0 : i64, scratch_operands = 0 : i64, tpu.core_type = #tpu.core_type<tc>, window_params = [{transform_indices = @transform_0, window_bounds = array<i64: 128, 128>}, {pipeline_mode = #tpu.pipeline_mode<synchronous>, transform_indices = @transform_1, window_bounds = array<i64: 128, 128>}, {transform_indices = @transform_2, window_bounds = array<i64: 128, 128>}]} {
    %c0 = arith.constant 0 : index
    %c0_0 = arith.constant 0 : index
    %0 = vector.load %arg1[%c0, %c0_0] : memref<128x128xbf16, #tpu.memory_space<vmem>>, vector<128x128xbf16>
    %c0_1 = arith.constant 0 : index
    %c0_2 = arith.constant 0 : index
    %1 = vector.load %arg2[%c0_1, %c0_2] : memref<128x128xbf16, #tpu.memory_space<vmem>>, vector<128x128xbf16>
    %cst = arith.constant dense<0.000000e+00> : vector<128x128xf32>
    %2 = tpu.matmul %0, %1, %cst {dimension_numbers = #tpu.dot_dimension_numbers<[1], [0], [0], [1], [0, 0, 1, 1], [], []>} : vector<128x128xbf16>, vector<128x128xbf16>, vector<128x128xf32> -> vector<128x128xf32>
    %3 = arith.truncf %2 : vector<128x128xf32> to vector<128x128xbf16>
    %c0_3 = arith.constant 0 : index
    %c0_4 = arith.constant 0 : index
    %4 = vector.load %arg3[%c0_3, %c0_4] : memref<128x128xbf16, #tpu.memory_space<vmem>>, vector<128x128xbf16>
    tpu.vector_store %arg3[%c0_3, %c0_4], %3 {strides = array<i32>} : memref<128x128xbf16, #tpu.memory_space<vmem>>, vector<128x128xbf16>,
    return
  }
  func.func @transform_0(%arg0: i32) -> (i32, i32) {
    %c0_i32 = arith.constant 0 : i32
    %c0_i32_0 = arith.constant 0 : i32
    return %arg0, %c0_i32 : i32, i32
  }
  func.func @transform_1(%arg0: i32) -> (i32, i32) {
    %c0_i32 = arith.constant 0 : i32
    %c0_i32_0 = arith.constant 0 : i32
    %c0_i32_1 = arith.constant 0 : i32
    return %c0_i32, %c0_i32_0 : i32, i32
  }
  func.func @transform_2(%arg0: i32) -> (i32, i32) {
    %c0_i32 = arith.constant 0 : i32
    %c0_i32_0 = arith.constant 0 : i32
    return %arg0, %c0_i32 : i32, i32
  }
}

</mosaic_0001>

<bundles_post_ra>
// kernel: tpu_custom_call.1
= control target key start
LH: loop header
LB: loop body
LE: loop exit
PB: predicated region body
PF: predicated region fallthrough
CT: control target
= control target key end

     0   :  { %7 = vsyncpa [#allocation3], 0  ;;  %s545_s0 = inlined_call_operand.hbm [shape: bf16[128,128], index: 0, kind: input, shape index: {}]   ;;  %s546_s1 = inlined_call_operand.hbm [shape: bf16[128,128], index: 1, kind: input, shape index: {}]   ;;  %s547_s2 = inlined_call_operand.hbm [shape: bf16[128,128], index: 2, kind: output, shape index: {}]  }
   0x1   :  { %8 = vsyncpa [#allocation6], 0 }
   0x2   :  { %9 = vsyncpa [#allocation4], 0  ;;  %s14_s11 = sshll.u32 %s545_s0, 4  ;;  %s507_s12 = smov [#allocation2]   ;;  %s15_s11 = int_to_ptr.hbm [resolvable:$true] %s14_s11 }
   0x3   :  { %s16_s13 = sshll.u32 %s507_s12, 4  ;;  %s27_s16 = sshll.u32 %s546_s1, 4  ;;  %s17_s13 = int_to_ptr.vmem [resolvable:$true] %s16_s13  ;;  %s28_s16 = int_to_ptr.hbm [resolvable:$true] %s27_s16 }
   0x4   :  { %s508_s17 = smov 64   ;;  %s509_s18 = smov 4  }
   0x5   :  { %22 = dma.hbm_to_vmem [thread:$0]  %s15_s11, 1024, %s17_s13, [#allocation3], %s508_s17, %s508_s17, %s509_s18  }
   0x6   :  { %s510_s19 = smov [#allocation5]  }
   0x7   :  { %s29_s20 = sshll.u32 %s510_s19, 4  ;;  %s30_s20 = int_to_ptr.vmem [resolvable:$true] %s29_s20 }
   0x8   :  { %35 = dma.hbm_to_vmem [thread:$0]  %s28_s16, 1024, %s30_s20, [#allocation6], %s508_s17, %s508_s17, %s509_s18  }
   0x9   :  { %501 = dma.done.wait [#allocation3], 1024  }
   0xa   :  { %502 = vsyncadd [#allocation3], 4294966272 }
   0xb   :  { %503 = dma.done.wait [#allocation6], 1024  }
   0xc   :  { %504 = vsyncadd [#allocation6], 4294966272  ;;  %v352_v0 = vld [vmem:[#allocation5 + $0x38] sm:$0xff]  ;;  %v351_v1 = vld [vmem:[#allocation5 + $0x30] sm:$0xff]  ;;  %s511_s0 = smov [#allocation7]   ;;  %s259_s23 = sshll.u32 %s547_s2, 4  ;;  %s260_s23 = int_to_ptr.hbm [resolvable:$true] %s259_s23 }
   0xd   :  { %172 = vmatpush.bf16.msra.mxu0 %v352_v0  ;;  %400 = vmatpush.bf16.msra.mxu1 %v352_v0  ;;  %v350_v2 = vld [vmem:[#allocation5 + $0x28] sm:$0xff]  ;;  %v349_v3 = vld [vmem:[#allocation5 + $0x20] sm:$0xff]  ;;  %v348_v4 = vld [vmem:[#allocation5 + $0x18] sm:$0xff]  ;;  %s257_s1 = sshll.u32 %s511_s0, 4  ;;  %s258_s1 = int_to_ptr.vmem [resolvable:$true] %s257_s1 }
   0xe   :  { %401 = vmatpush.bf16.msra.mxu2 %v352_v0  ;;  %402 = vmatpush.bf16.msra.mxu3 %v352_v0  ;;  %v347_v5 = vld [vmem:[#allocation5 + $0x10] sm:$0xff]  ;;  %v346_v6 = vld [vmem:[#allocation5 + $0x8] sm:$0xff]  ;;  %v345_v7 = vld [vmem:[#allocation5] sm:$0xff] }
   0xf   :  { %v337_v8 = vld [vmem:[#allocation2] sm:$0xff]  ;;  %v339_v9 = vld [vmem:[#allocation2 + $0x10] sm:$0xff]  ;;  %v338_v12 = vld [vmem:[#allocation2 + $0x8] sm:$0xff] }
  0x10   :  { %v341_v10 = vld [vmem:[#allocation2 + $0x20] sm:$0xff]  ;;  %v343_v11 = vld [vmem:[#allocation2 + $0x30] sm:$0xff]  ;;  %v340_v13 = vld [vmem:[#allocation2 + $0x18] sm:$0xff] }
  0x11   :  { %173 = vmatpush.bf16.msra.mxu0 %v351_v1  ;;  %403 = vmatpush.bf16.msra.mxu1 %v351_v1  ;;  %v342_v14 = vld [vmem:[#allocation2 + $0x28] sm:$0xff]  ;;  %v344_v15 = vld [vmem:[#allocation2 + $0x38] sm:$0xff] }
  0x12   :  { %404 = vmatpush.bf16.msra.mxu2 %v351_v1  ;;  %405 = vmatpush.bf16.msra.mxu3 %v351_v1 }
  0x15   :  { %174 = vmatpush.bf16.msra.mxu0 %v350_v2  ;;  %406 = vmatpush.bf16.msra.mxu1 %v350_v2 }
  0x16   :  { %407 = vmatpush.bf16.msra.mxu2 %v350_v2  ;;  %408 = vmatpush.bf16.msra.mxu3 %v350_v2 }
  0x19   :  { %175 = vmatpush.bf16.msra.mxu0 %v349_v3  ;;  %409 = vmatpush.bf16.msra.mxu1 %v349_v3 }
  0x1a   :  { %410 = vmatpush.bf16.msra.mxu2 %v349_v3  ;;  %411 = vmatpush.bf16.msra.mxu3 %v349_v3 }
  0x1d   :  { %176 = vmatpush.bf16.msra.mxu0 %v348_v4  ;;  %412 = vmatpush.bf16.msra.mxu1 %v348_v4 }
  0x1e   :  { %413 = vmatpush.bf16.msra.mxu2 %v348_v4  ;;  %414 = vmatpush.bf16.msra.mxu3 %v348_v4 }
  0x21   :  { %177 = vmatpush.bf16.msra.mxu0 %v347_v5  ;;  %415 = vmatpush.bf16.msra.mxu1 %v347_v5 }
  0x22   :  { %416 = vmatpush.bf16.msra.mxu2 %v347_v5  ;;  %417 = vmatpush.bf16.msra.mxu3 %v347_v5 }
  0x25   :  { %178 = vmatpush.bf16.msra.mxu0 %v346_v6  ;;  %418 = vmatpush.bf16.msra.mxu1 %v346_v6 }
  0x26   :  { %419 = vmatpush.bf16.msra.mxu2 %v346_v6  ;;  %420 = vmatpush.bf16.msra.mxu3 %v346_v6 }
  0x29   :  { %179 = vmatpush.bf16.msra.mxu0 %v345_v7  ;;  %421 = vmatpush.bf16.msra.mxu1 %v345_v7 }
  0x2a   :  { %422 = vmatpush.bf16.msra.mxu2 %v345_v7  ;;  %423 = vmatpush.bf16.msra.mxu3 %v345_v7 }
  0x2c   :  { %180 = vmatmul.bf16.vlgmr.msra.gmra.mxu0 %v337_v8  ;;  %190 = vmatmul.bf16.vlgmr.msra.gmra.mxu1 %v339_v9 }
  0x2d   :  { %200 = vmatmul.bf16.vlgmr.msra.gmra.mxu2 %v341_v10  ;;  %210 = vmatmul.bf16.vlgmr.msra.gmra.mxu3 %v343_v11 }
  0x3c   :  { %185 = vmatmul.bf16.gmra.mxu0 %v338_v12  ;;  %195 = vmatmul.bf16.gmra.mxu1 %v340_v13 }
  0x3d   :  { %205 = vmatmul.bf16.gmra.mxu2 %v342_v14  ;;  %215 = vmatmul.bf16.gmra.mxu3 %v344_v15 }
  0xa9   :  { %v181_v16 = vpop.f32.mrf.mxu0  ;;  %v191_v17 = vpop.f32.mrf.mxu1 }
  0xb0   :  { %v201_v18 = vpop.f32.mrf.mxu2  ;;  %v211_v19 = vpop.f32.mrf.mxu3 }
  0xb1   :  { %v183_v20 = vpop.f32.mrf.mxu0  ;;  %v193_v21 = vpop.f32.mrf.mxu1 }
  0xb2   :  { %v356_v22 = vpack.c.bf16 %v183_v20, %v181_v16  ;;  %v366_v23 = vpack.c.bf16 %v193_v21, %v191_v17 }
  0xb4   :  { %357 = vst [vmem:[#allocation7] sm:$0xff] %v356_v22  }
  0xb5   :  { %394 = vst [vmem:[#allocation7 + $0x10] sm:$0xff] %v366_v23  }
  0xb8   :  { %v203_v24 = vpop.f32.mrf.mxu2  ;;  %v213_v25 = vpop.f32.mrf.mxu3 }
  0xb9   :  { %v376_v26 = vpack.c.bf16 %v203_v24, %v201_v18  ;;  %v386_v27 = vpack.c.bf16 %v213_v25, %v211_v19  ;;  %v186_v28 = vpop.f32.mrf.mxu0  ;;  %v196_v29 = vpop.f32.mrf.mxu1 }
  0xbb   :  { %396 = vst [vmem:[#allocation7 + $0x20] sm:$0xff] %v376_v26  }
  0xbc   :  { %398 = vst [vmem:[#allocation7 + $0x30] sm:$0xff] %v386_v27  }
  0xc0   :  { %v206_v30 = vpop.f32.mrf.mxu2  ;;  %v216_v31 = vpop.f32.mrf.mxu3 }
  0xc1   :  { %v188_v32 = vpop.f32.mrf.mxu0  ;;  %v198_v33 = vpop.f32.mrf.mxu1 }
  0xc2   :  { %v361_v34 = vpack.c.bf16 %v188_v32, %v186_v28  ;;  %v371_v35 = vpack.c.bf16 %v198_v33, %v196_v29 }
  0xc4   :  { %393 = vst [vmem:[#allocation7 + $0x8] sm:$0xff] %v361_v34  }
  0xc5   :  { %395 = vst [vmem:[#allocation7 + $0x18] sm:$0xff] %v371_v35  }
  0xc8   :  { %v208_v36 = vpop.f32.mrf.mxu2  ;;  %v218_v37 = vpop.f32.mrf.mxu3 }
  0xc9   :  { %v381_v38 = vpack.c.bf16 %v208_v36, %v206_v30  ;;  %v391_v39 = vpack.c.bf16 %v218_v37, %v216_v31 }
  0xcb   :  { %397 = vst [vmem:[#allocation7 + $0x28] sm:$0xff] %v381_v38  }
  0xcc   :  { %399 = vst [vmem:[#allocation7 + $0x38] sm:$0xff] %v391_v39  }
  0xcd   :  { %265 = dma.vmem_to_hbm [thread:$0]  %s258_s1, 1024, %s260_s23, [#allocation4], %s508_s17, %s508_s17, %s509_s18  }
  0xce   :  { %505 = dma.done.wait [#allocation4], 1024  }
  0xcf   :  { %506 = vsyncadd [#allocation4], 4294966272 }
  0xd0   :  { %270 = vsyncpa [#allocation3], 1 }
  0xd1   :  { %271 = vsyncpa [#allocation6], 1 }
  0xd2   :  { %272 = vsyncpa [#allocation4], 1 }

</bundles_post_ra>
